<compile_context>
chip_gen: v5e
topology: v5e:2x2
jax: 0.10.0
libtpu: 0.0.40
codegen_flags: <defaults>
</compile_context>

<pallas_src>
import functools

import jax
import jax.numpy as jnp
from jax.experimental import pallas as pl
from jax.experimental.pallas import tpu as pltpu


def _round_up(v, m):
    return (v + m - 1) // m * m


def _cdiv(a, b):
    return (a + b - 1) // b


# ---------------------------------------------------------------------------
# Kernels
# ---------------------------------------------------------------------------
def _prenorm_full_kernel(x_ref, gamma_ref, w_ref, b_ref, o_ref):
    # x_ref:     (tm, D)  input rows (full feature dim)
    # gamma_ref: (1, D)   f32, already multiplied by sqrt(dim)
    # w_ref:     (D, D)   bf16 weight, (in, out) layout, resident
    # b_ref:     (1, D)   f32 bias
    # o_ref:     (tm, D)  output rows
    x = x_ref[...].astype(jnp.float32)
    # RMSNorm: 1/max(||x||, 1e-12) == rsqrt(max(||x||^2, 1e-24))  (one EUP op)
    ssq = jnp.sum(x * x, axis=-1, keepdims=True)
    inv = jax.lax.rsqrt(jnp.maximum(ssq, 1e-24))
    normed = ((x * inv) * gamma_ref[...]).astype(jnp.bfloat16)
    # fn == Linear(dim, dim): bf16 operands on the MXU, f32 accumulation.
    y = jnp.dot(normed, w_ref[...], preferred_element_type=jnp.float32)
    # residual reuses the x already held in vregs (no second pass over x_ref)
    o_ref[...] = (y + b_ref[...] + x).astype(o_ref.dtype)


def _prenorm_coltiled_kernel(x_ref, gamma_ref, w_ref, b_ref, o_ref,
                             normed_ref, *, tn):
    # Rows outermost, columns innermost.  The x block index is invariant
    # across the inner column loop (Pallas DMAs it once per row tile);
    # `normed` is computed once per row tile and cached in VMEM scratch.
    j = pl.program_id(1)

    @pl.when(j == 0)
    def _():
        x = x_ref[...].astype(jnp.float32)
        ssq = jnp.sum(x * x, axis=-1, keepdims=True)
        inv = jax.lax.rsqrt(jnp.maximum(ssq, 1e-24))
        normed_ref[...] = ((x * inv) * gamma_ref[...]).astype(jnp.bfloat16)

    y = jnp.dot(normed_ref[...], w_ref[...], preferred_element_type=jnp.float32)
    col = pl.multiple_of(j * tn, 128)
    x_res = x_ref[:, pl.ds(col, tn)].astype(jnp.float32)
    o_ref[...] = (y + b_ref[...] + x_res).astype(o_ref.dtype)


# ---------------------------------------------------------------------------
# Planning (per-dim, per-dtype) & one-time parameter prep
# ---------------------------------------------------------------------------
def _footprint(tm, tn, n_col, d_pad, in_b, out_b):
    w_bufs = 1 if n_col == 1 else 2              # invariant W -> Buffered(1)
    return (2 * tm * d_pad * in_b                # x tile, double-buffered
            + 2 * tm * tn * out_b                # out tile, double-buffered
            + w_bufs * d_pad * tn * 2            # bf16 weight block
            + d_pad * 4 + 2 * tn * 4             # gamma, bias
            + (tm * d_pad * 2 if n_col > 1 else 0)   # normed scratch
            + 4 * tm * d_pad * 4)                # f32 elementwise temporaries


def make_plan(dim, in_dtype, out_dtype):
    """Tiling plan for a given feature dim; independent of the row count."""
    in_b = jnp.dtype(in_dtype).itemsize
    out_b = jnp.dtype(out_dtype).itemsize
    d_base = _round_up(dim, 128)

    try:
        vmem_cap = int(pltpu.get_tpu_info().vmem_capacity_bytes)
    except Exception:
        vmem_cap = 128 << 20
    # Leave headroom for compiler-internal scratch: <= ~52 MiB on v7x
    # (64 MiB physical per TC), <= 100 MiB on v5e/v6e (128 MiB physical).
    budget = max(min(vmem_cap - (12 << 20), 100 << 20), 24 << 20)

    chosen = None
    # 1) Preferred: full-width columns (n_col == 1) -- x and W are each read
    #    from HBM exactly once and W stays resident, single-buffered.
    for tm in (512, 256, 128, 64):
        fp = _footprint(tm, d_base, 1, d_base, in_b, out_b)
        if fp <= budget:
            chosen = (tm, d_base, 1, d_base, fp)
            break

    # 2) Huge dim only: tile columns.  Largest tm first (total W re-stream
    #    traffic ~ n_row * D^2, independent of tn), then the widest
    #    256-multiple tn (MXU-native on v6e/v7x).
    if chosen is None:
        col_tns = sorted(
            {max(_round_up(_cdiv(d_base, k), 256), 256)
             for k in range(2, _cdiv(d_base, 256) + 1)} | {128},
            reverse=True)
        for tm in (512, 256, 128, 64, 32, 16, 8):
            for tn in col_tns:
                if tn >= d_base:
                    continue
                n_col = _cdiv(d_base, tn)
                d_pad = n_col * tn
                fp = _footprint(tm, tn, n_col, d_pad, in_b, out_b)
                if fp <= budget:
                    chosen = (tm, tn, n_col, d_pad, fp)
                    break
            if chosen is not None:
                break

    if chosen is None:  # pathological fallback
        tn = 128
        n_col = _cdiv(d_base, tn)
        d_pad = n_col * tn
        chosen = (8, tn, n_col, d_pad,
                  _footprint(8, tn, n_col, d_pad, in_b, out_b))

    tm_cap, tn, n_col, d_pad, fp = chosen
    vmem_limit = int(min(max(fp + (8 << 20), 32 << 20), budget))
    return {"dim": dim, "d_pad": d_pad, "tn": tn, "n_col": n_col,
            "tm_cap": tm_cap, "vmem_limit": vmem_limit}


def prepare_params(gamma, w, b, plan):
    """One-time parameter prep (cast + pad) -- hoisted out of the hot path."""
    dim, d_pad = plan["dim"], plan["d_pad"]
    pad = d_pad - dim
    # sqrt(dim) folded into gamma; gamma/bias stay f32, W feeds the MXU bf16.
    gamma_p = jnp.pad(gamma.astype(jnp.float32) * (float(dim) ** 0.5),
                      (0, pad)).reshape(1, d_pad)
    w_p = jnp.pad(w.astype(jnp.bfloat16), ((0, pad), (0, pad)))
    b_p = jnp.pad(b.astype(jnp.float32), (0, pad)).reshape(1, d_pad)
    return gamma_p, w_p, b_p


def _pick_row_tile(rows, tm_cap):
    """Return (tm, rows_padded), padding rows as little as possible."""
    if rows <= tm_cap:
        return rows, rows                          # single row tile, no pad
    rows8 = _round_up(rows, 8)
    d = tm_cap - tm_cap % 8
    while d >= 8:
        if rows8 % d == 0:
            break
        d -= 8
    if d >= max(64, tm_cap // 4):
        return d, rows8                            # pad only to multiple of 8
    return tm_cap, _round_up(rows, tm_cap)         # ragged tail: pad to tm_cap


# ---------------------------------------------------------------------------
# Forward
# ---------------------------------------------------------------------------
def prenorm_linear(x, gamma_p, w_p, b_p, plan):
    """x: (B, T, dim); gamma_p/w_p/b_p from prepare_params(plan)."""
    B, T, dim = x.shape
    assert dim == plan["dim"]
    d_pad, tn, n_col = plan["d_pad"], plan["tn"], plan["n_col"]

    rows = B * T
    tm, rows_p = _pick_row_tile(rows, plan["tm_cap"])
    n_row = rows_p // tm

    x2 = x.reshape(rows, dim)
    if rows_p != rows or d_pad != dim:
        x2 = jnp.pad(x2, ((0, rows_p - rows), (0, d_pad - dim)))

    in_b = x2.dtype.itemsize
    out_dtype = x.dtype
    out_b = jnp.dtype(out_dtype).itemsize

    w_bytes = d_pad * d_pad * 2 * (1 if n_col == 1 else n_row)
    cost = pl.CostEstimate(
        flops=2 * rows_p * d_pad * d_pad + 8 * rows_p * d_pad,
        transcendentals=rows_p,
        bytes_accessed=rows_p * d_pad * (in_b + out_b) + w_bytes + d_pad * 12,
    )

    def build(single_buffer):
        def spec(shape, index_map, invariant=False):
            if single_buffer and invariant:
                return pl.BlockSpec(shape, index_map,
                                    pipeline_mode=pl.Buffered(1))
            return pl.BlockSpec(shape, index_map)

        if n_col == 1:
            grid = (n_row,)
            in_specs = [
                spec((tm, d_pad), lambda i: (i, 0)),                     # x
                spec((1, d_pad), lambda i: (0, 0), invariant=True),      # gamma
                spec((d_pad, d_pad), lambda i: (0, 0), invariant=True),  # W
                spec((1, d_pad), lambda i: (0, 0), invariant=True),      # bias
            ]
            out_specs = pl.BlockSpec((tm, d_pad), lambda i: (i, 0))
            scratch = []
            kernel = _prenorm_full_kernel
            dims = ("parallel",)
        else:
            grid = (n_row, n_col)      # rows outermost (megacore-shardable)
            in_specs = [
                spec((tm, d_pad), lambda i, j: (i, 0)),                  # x
                spec((1, d_pad), lambda i, j: (0, 0), invariant=True),   # gamma
                spec((d_pad, tn), lambda i, j: (0, j)),                  # W block
                spec((1, tn), lambda i, j: (0, j)),                      # bias
            ]
            out_specs = pl.BlockSpec((tm, tn), lambda i, j: (i, j))
            scratch = [pltpu.VMEM((tm, d_pad), jnp.bfloat16)]            # normed
            kernel = functools.partial(_prenorm_coltiled_kernel, tn=tn)
            dims = ("parallel", "arbitrary")

        return pl.pallas_call(
            kernel,
            out_shape=jax.ShapeDtypeStruct((rows_p, d_pad), out_dtype),
            grid_spec=pltpu.PrefetchScalarGridSpec(
                num_scalar_prefetch=0,
                grid=grid,
                in_specs=in_specs,
                out_specs=out_specs,
                scratch_shapes=scratch),
            compiler_params=pltpu.CompilerParams(
                dimension_semantics=dims,
                vmem_limit_bytes=plan["vmem_limit"]),
            cost_estimate=cost,
        )

    try:
        out = build(True)(x2, gamma_p, w_p, b_p)
    except Exception:
        # Fallback if pipeline_mode=pl.Buffered(1) is unsupported by this
        # jax/libtpu build; identical semantics, default double-buffering.
        out = build(False)(x2, gamma_p, w_p, b_p)

    return out[:rows, :dim].reshape(B, T, dim)


# ---------------------------------------------------------------------------
# Reference & demo
# ---------------------------------------------------------------------------
def _reference(x, gamma, w, b):
    scale = x.shape[-1] ** 0.5
    x32 = x.astype(jnp.float32)
    l2 = jnp.sqrt(jnp.sum(x32 * x32, axis=-1, keepdims=True))
    normed = x32 / jnp.maximum(l2, 1e-12) * scale * gamma
    y = normed @ w + b
    return (y + x32).astype(x.dtype)


if __name__ == "__main__":
    key = jax.random.PRNGKey(0)
    B, T, D = 2, 8, 32

    kx, kw, kb = jax.random.split(key, 3)
    x = jax.random.normal(kx, (B, T, D), dtype=jnp.float32)

    # RMSNorm.gamma initialized to ones (as in the module's __init__).
    gamma = jnp.ones((D,), dtype=jnp.float32)
    # fn = Linear(D, D): deterministic synthetic weights; stored as (in, out).
    w = jax.random.normal(kw, (D, D), dtype=jnp.float32) / D ** 0.5
    b = jax.random.normal(kb, (D,), dtype=jnp.float32) * 0.01

    plan = make_plan(D, x.dtype, x.dtype)
    gamma_p, w_p, b_p = prepare_params(gamma, w, b, plan)   # one-time prep

    out = prenorm_linear(x, gamma_p, w_p, b_p, plan)
    jax.block_until_ready(out)

    ref = _reference(x, gamma, w, b)
    # bf16 MXU operands (f32 accumulation) -> loosened tolerance vs pure f32.
    assert jnp.allclose(out, ref, atol=3e-2, rtol=3e-2), "mismatch vs reference"

    print("KERNEL_OK")
</pallas_src>

<mosaic_0001>
module attributes {stable_mosaic.version = 11 : i64} {
  func.func @_prenorm_full_kernel(%arg0: i32, %arg1: memref<16x128xf32, #tpu.memory_space<vmem>>, %arg2: memref<1x128xf32, #tpu.memory_space<vmem>>, %arg3: memref<128x128xbf16, #tpu.memory_space<vmem>>, %arg4: memref<1x128xf32, #tpu.memory_space<vmem>>, %arg5: memref<16x128xf32, #tpu.memory_space<vmem>>) attributes {dimension_semantics = [#tpu.dimension_semantics<parallel>], iteration_bounds = array<i64: 1>, scalar_prefetch = 0 : i64, scratch_operands = 0 : i64, tpu.core_type = #tpu.core_type<tc>, window_params = [{transform_indices = @transform_0, window_bounds = array<i64: 16, 128>}, {pipeline_mode = #tpu.pipeline_mode<synchronous>, transform_indices = @transform_1, window_bounds = array<i64: 1, 128>}, {pipeline_mode = #tpu.pipeline_mode<synchronous>, transform_indices = @transform_2, window_bounds = array<i64: 128, 128>}, {pipeline_mode = #tpu.pipeline_mode<synchronous>, transform_indices = @transform_3, window_bounds = array<i64: 1, 128>}, {transform_indices = @transform_4, window_bounds = array<i64: 16, 128>}]} {
    %c0 = arith.constant 0 : index
    %c0_0 = arith.constant 0 : index
    %0 = vector.load %arg1[%c0, %c0_0] : memref<16x128xf32, #tpu.memory_space<vmem>>, vector<16x128xf32>
    %1 = arith.mulf %0, %0 : vector<16x128xf32>
    %cst = arith.constant dense<0.000000e+00> : vector<16xf32>
    %2 = vector.multi_reduction <add>, %1, %cst [1] : vector<16x128xf32> to vector<16xf32>
    %3 = vector.shape_cast %2 : vector<16xf32> to vector<16x1xf32>
    %cst_1 = arith.constant 1.000000e-24 : f32
    %4 = vector.broadcast %cst_1 : f32 to vector<16x1xf32>
    %5 = arith.maximumf %3, %4 : vector<16x1xf32>
    %6 = math.rsqrt %5 : vector<16x1xf32>
    %7 = vector.broadcast %6 : vector<16x1xf32> to vector<16x128xf32>
    %8 = arith.mulf %0, %7 : vector<16x128xf32>
    %c0_2 = arith.constant 0 : index
    %c0_3 = arith.constant 0 : index
    %9 = vector.load %arg2[%c0_2, %c0_3] : memref<1x128xf32, #tpu.memory_space<vmem>>, vector<1x128xf32>
    %10 = vector.broadcast %9 : vector<1x128xf32> to vector<16x128xf32>
    %11 = arith.mulf %8, %10 : vector<16x128xf32>
    %12 = arith.truncf %11 : vector<16x128xf32> to vector<16x128xbf16>
    %c0_4 = arith.constant 0 : index
    %c0_5 = arith.constant 0 : index
    %13 = vector.load %arg3[%c0_4, %c0_5] : memref<128x128xbf16, #tpu.memory_space<vmem>>, vector<128x128xbf16>
    %cst_6 = arith.constant dense<0.000000e+00> : vector<16x128xf32>
    %14 = tpu.matmul %12, %13, %cst_6 {dimension_numbers = #tpu.dot_dimension_numbers<[1], [0], [0], [1], [0, 0, 1, 1], [], []>} : vector<16x128xbf16>, vector<128x128xbf16>, vector<16x128xf32> -> vector<16x128xf32>
    %c0_7 = arith.constant 0 : index
    %c0_8 = arith.constant 0 : index
    %15 = vector.load %arg4[%c0_7, %c0_8] : memref<1x128xf32, #tpu.memory_space<vmem>>, vector<1x128xf32>
    %16 = vector.broadcast %15 : vector<1x128xf32> to vector<16x128xf32>
    %17 = arith.addf %14, %16 : vector<16x128xf32>
    %18 = arith.addf %17, %0 : vector<16x128xf32>
    %c0_9 = arith.constant 0 : index
    %c0_10 = arith.constant 0 : index
    %19 = vector.load %arg5[%c0_9, %c0_10] : memref<16x128xf32, #tpu.memory_space<vmem>>, vector<16x128xf32>
    tpu.vector_store %arg5[%c0_9, %c0_10], %18 {strides = array<i32>} : memref<16x128xf32, #tpu.memory_space<vmem>>, vector<16x128xf32>,
    return
  }
  func.func @transform_0(%arg0: i32) -> (i32, i32) {
    %c0_i32 = arith.constant 0 : i32
    %c0_i32_0 = arith.constant 0 : i32
    return %arg0, %c0_i32 : i32, i32
  }
  func.func @transform_1(%arg0: i32) -> (i32, i32) {
    %c0_i32 = arith.constant 0 : i32
    %c0_i32_0 = arith.constant 0 : i32
    %c0_i32_1 = arith.constant 0 : i32
    return %c0_i32, %c0_i32_0 : i32, i32
  }
  func.func @transform_2(%arg0: i32) -> (i32, i32) {
    %c0_i32 = arith.constant 0 : i32
    %c0_i32_0 = arith.constant 0 : i32
    %c0_i32_1 = arith.constant 0 : i32
    return %c0_i32, %c0_i32_0 : i32, i32
  }
  func.func @transform_3(%arg0: i32) -> (i32, i32) {
    %c0_i32 = arith.constant 0 : i32
    %c0_i32_0 = arith.constant 0 : i32
    %c0_i32_1 = arith.constant 0 : i32
    return %c0_i32, %c0_i32_0 : i32, i32
  }
  func.func @transform_4(%arg0: i32) -> (i32, i32) {
    %c0_i32 = arith.constant 0 : i32
    %c0_i32_0 = arith.constant 0 : i32
    return %arg0, %c0_i32 : i32, i32
  }
}

module attributes {stable_mosaic.version = 11 : i64} {
  func.func @_prenorm_full_kernel(%arg0: i32, %arg1: memref<16x128xf32, #tpu.memory_space<vmem>>, %arg2: memref<1x128xf32, #tpu.memory_space<vmem>>, %arg3: memref<128x128xbf16, #tpu.memory_space<vmem>>, %arg4: memref<1x128xf32, #tpu.memory_space<vmem>>, %arg5: memref<16x128xf32, #tpu.memory_space<vmem>>) attributes {dimension_semantics = [#tpu.dimension_semantics<parallel>], iteration_bounds = array<i64: 1>, scalar_prefetch = 0 : i64, scratch_operands = 0 : i64, tpu.core_type = #tpu.core_type<tc>, window_params = [{transform_indices = @transform_0, window_bounds = array<i64: 16, 128>}, {pipeline_mode = #tpu.pipeline_mode<synchronous>, transform_indices = @transform_1, window_bounds = array<i64: 1, 128>}, {pipeline_mode = #tpu.pipeline_mode<synchronous>, transform_indices = @transform_2, window_bounds = array<i64: 128, 128>}, {pipeline_mode = #tpu.pipeline_mode<synchronous>, transform_indices = @transform_3, window_bounds = array<i64: 1, 128>}, {transform_indices = @transform_4, window_bounds = array<i64: 16, 128>}]} {
    %c0 = arith.constant 0 : index
    %c0_0 = arith.constant 0 : index
    %0 = vector.load %arg1[%c0, %c0_0] : memref<16x128xf32, #tpu.memory_space<vmem>>, vector<16x128xf32>
    %1 = arith.mulf %0, %0 : vector<16x128xf32>
    %cst = arith.constant dense<0.000000e+00> : vector<16xf32>
    %2 = vector.multi_reduction <add>, %1, %cst [1] : vector<16x128xf32> to vector<16xf32>
    %3 = vector.shape_cast %2 : vector<16xf32> to vector<16x1xf32>
    %cst_1 = arith.constant 1.000000e-24 : f32
    %4 = vector.broadcast %cst_1 : f32 to vector<16x1xf32>
    %5 = arith.maximumf %3, %4 : vector<16x1xf32>
    %6 = math.rsqrt %5 : vector<16x1xf32>
    %7 = vector.broadcast %6 : vector<16x1xf32> to vector<16x128xf32>
    %8 = arith.mulf %0, %7 : vector<16x128xf32>
    %c0_2 = arith.constant 0 : index
    %c0_3 = arith.constant 0 : index
    %9 = vector.load %arg2[%c0_2, %c0_3] : memref<1x128xf32, #tpu.memory_space<vmem>>, vector<1x128xf32>
    %10 = vector.broadcast %9 : vector<1x128xf32> to vector<16x128xf32>
    %11 = arith.mulf %8, %10 : vector<16x128xf32>
    %12 = arith.truncf %11 : vector<16x128xf32> to vector<16x128xbf16>
    %c0_4 = arith.constant 0 : index
    %c0_5 = arith.constant 0 : index
    %13 = vector.load %arg3[%c0_4, %c0_5] : memref<128x128xbf16, #tpu.memory_space<vmem>>, vector<128x128xbf16>
    %cst_6 = arith.constant dense<0.000000e+00> : vector<16x128xf32>
    %14 = tpu.matmul %12, %13, %cst_6 {dimension_numbers = #tpu.dot_dimension_numbers<[1], [0], [0], [1], [0, 0, 1, 1], [], []>} : vector<16x128xbf16>, vector<128x128xbf16>, vector<16x128xf32> -> vector<16x128xf32>
    %c0_7 = arith.constant 0 : index
    %c0_8 = arith.constant 0 : index
    %15 = vector.load %arg4[%c0_7, %c0_8] : memref<1x128xf32, #tpu.memory_space<vmem>>, vector<1x128xf32>
    %16 = vector.broadcast %15 : vector<1x128xf32> to vector<16x128xf32>
    %17 = arith.addf %14, %16 : vector<16x128xf32>
    %18 = arith.addf %17, %0 : vector<16x128xf32>
    %c0_9 = arith.constant 0 : index
    %c0_10 = arith.constant 0 : index
    %19 = vector.load %arg5[%c0_9, %c0_10] : memref<16x128xf32, #tpu.memory_space<vmem>>, vector<16x128xf32>
    tpu.vector_store %arg5[%c0_9, %c0_10], %18 {strides = array<i32>} : memref<16x128xf32, #tpu.memory_space<vmem>>, vector<16x128xf32>,
    return
  }
  func.func @transform_0(%arg0: i32) -> (i32, i32) {
    %c0_i32 = arith.constant 0 : i32
    %c0_i32_0 = arith.constant 0 : i32
    return %arg0, %c0_i32 : i32, i32
  }
  func.func @transform_1(%arg0: i32) -> (i32, i32) {
    %c0_i32 = arith.constant 0 : i32
    %c0_i32_0 = arith.constant 0 : i32
    %c0_i32_1 = arith.constant 0 : i32
    return %c0_i32, %c0_i32_0 : i32, i32
  }
  func.func @transform_2(%arg0: i32) -> (i32, i32) {
    %c0_i32 = arith.constant 0 : i32
    %c0_i32_0 = arith.constant 0 : i32
    %c0_i32_1 = arith.constant 0 : i32
    return %c0_i32, %c0_i32_0 : i32, i32
  }
  func.func @transform_3(%arg0: i32) -> (i32, i32) {
    %c0_i32 = arith.constant 0 : i32
    %c0_i32_0 = arith.constant 0 : i32
    %c0_i32_1 = arith.constant 0 : i32
    return %c0_i32, %c0_i32_0 : i32, i32
  }
  func.func @transform_4(%arg0: i32) -> (i32, i32) {
    %c0_i32 = arith.constant 0 : i32
    %c0_i32_0 = arith.constant 0 : i32
    return %arg0, %c0_i32 : i32, i32
  }
}

</mosaic_0001>

<bundles_post_ra>
// kernel: tpu_custom_call.1
= control target key start
LH: loop header
LB: loop body
LE: loop exit
PB: predicated region body
PF: predicated region fallthrough
CT: control target
= control target key end

     0   :  { %9 = vsyncpa [#allocation3], 0  ;;  %s418_s0 = inlined_call_operand.hbm [shape: f32[16,128], index: 0, kind: input, shape index: {}]   ;;  %s419_s1 = inlined_call_operand.hbm [shape: f32[1,128], index: 1, kind: input, shape index: {}]   ;;  %s420_s2 = inlined_call_operand.hbm [shape: bf16[128,128], index: 2, kind: input, shape index: {}]   ;;  %s421_s3 = inlined_call_operand.vmem [shape: f32[1,128], index: 3, kind: input, shape index: {}]   ;;  %s422_s4 = inlined_call_operand.hbm [shape: f32[16,128], index: 4, kind: output, shape index: {}]  }
   0x1   :  { %10 = vsyncpa [#allocation6], 0  ;;  %s30_s17 = sshll.u32 %s419_s1, 4  ;;  %s31_s17 = int_to_ptr.hbm [resolvable:$true] %s30_s17 }
   0x2   :  { %11 = vsyncpa [#allocation4], 0  ;;  %s364_s18 = smov [#allocation5]   ;;  %s16_s22 = sshll.u32 %s418_s0, 4  ;;  %s17_s22 = int_to_ptr.hbm [resolvable:$true] %s16_s22 }
   0x3   :  { %s32_s19 = sshll.u32 %s364_s18, 4  ;;  %s365_s23 = smov [#allocation2]   ;;  %s33_s19 = int_to_ptr.vmem [resolvable:$true] %s32_s19 }
   0x4   :  { %35 = dma.hbm_to_vmem [thread:$0]  %s31_s17, 16, %s33_s19, [#allocation6]  }
   0x5   :  { %s18_s24 = sshll.u32 %s365_s23, 4  ;;  %s366_s25 = smov 128   ;;  %s19_s24 = int_to_ptr.vmem [resolvable:$true] %s18_s24 }
   0x6   :  { %s367_s26 = smov 8   ;;  %s40_s28 = sshll.u32 %s420_s2, 4  ;;  %s41_s28 = int_to_ptr.hbm [resolvable:$true] %s40_s28 }
   0x7   :  { %24 = dma.hbm_to_vmem [thread:$0]  %s17_s22, 256, %s19_s24, [#allocation3], %s366_s25, %s366_s25, %s367_s26  }
   0x8   :  { %s368_s29 = smov [#allocation7]   ;;  %s369_s0 = smov 64  }
   0x9   :  { %s42_s30 = sshll.u32 %s368_s29, 4  ;;  %s370_s5 = smov 4   ;;  %s43_s30 = int_to_ptr.vmem [resolvable:$true] %s42_s30 }
   0xa   :  { %48 = dma.hbm_to_vmem [thread:$0]  %s41_s28, 1024, %s43_s30, [#allocation6], %s369_s0, %s369_s0, %s370_s5  }
   0xb   :  { %358 = dma.done.wait [#allocation3], 256  }
   0xc   :  { %359 = vsyncadd [#allocation3], 4294967040 }
   0xd   :  { %360 = dma.done.wait [#allocation6], 1040  }
   0xe   :  { %361 = vsyncadd [#allocation6], 4294966256  ;;  %v63_v0 = vld [vmem:[#allocation2] sm:$0xff]  ;;  %v64_v2 = vld [vmem:[#allocation2 + $0x8] sm:$0xff]  ;;  %s371_s7 = smov [#allocation8]   ;;  %s194_s11 = sshll.u32 %s422_s4, 4  ;;  %s195_s11 = int_to_ptr.hbm [resolvable:$true] %s194_s11 }
   0xf   :  { %v65_v1 = vmul.f32 %v63_v0, %v63_v0  ;;  %v66_v3 = vmul.f32 %v64_v2, %v64_v2  ;;  %v247_v4 = vld [vmem:[#allocation7 + $0x38] sm:$0xff]  ;;  %v246_v5 = vld [vmem:[#allocation7 + $0x30] sm:$0xff]  ;;  %v245_v6 = vld [vmem:[#allocation7 + $0x28] sm:$0xff]  ;;  %s192_s8 = sshll.u32 %s371_s7, 4  ;;  %s193_s8 = int_to_ptr.vmem [resolvable:$true] %s192_s8 }
  0x10   :  { %170 = vmatpush.bf16.msra.mxu0 %v247_v4  ;;  %v244_v7 = vld [vmem:[#allocation7 + $0x20] sm:$0xff]  ;;  %v243_v8 = vld [vmem:[#allocation7 + $0x18] sm:$0xff]  ;;  %v242_v9 = vld [vmem:[#allocation7 + $0x10] sm:$0xff] }
  0x11   :  { %67 = vadd.xlane.f32.xlu0 %v65_v1  ;;  %v241_v10 = vld [vmem:[#allocation7 + $0x8] sm:$0xff]  ;;  %v240_v11 = vld [vmem:[#allocation7] sm:$0xff]  ;;  %v256_v30 = vld [vmem:[#allocation5] ss:$0 sm:$0xff] }
  0x12   :  { %v257_v36 = vld [vmem:[%s421_s3] ss:$0 sm:$0xff] }
  0x14   :  { %171 = vmatpush.bf16.msra.mxu0 %v246_v5 }
  0x18   :  { %172 = vmatpush.bf16.msra.mxu0 %v245_v6 }
  0x19   :  { %69 = vadd.xlane.f32.xlu0 %v66_v3 }
  0x1c   :  { %173 = vmatpush.bf16.msra.mxu0 %v244_v7 }
  0x20   :  { %174 = vmatpush.bf16.msra.mxu0 %v243_v8 }
  0x24   :  { %175 = vmatpush.bf16.msra.mxu0 %v242_v9 }
  0x28   :  { %176 = vmatpush.bf16.msra.mxu0 %v241_v10 }
  0x2c   :  { %177 = vmatpush.bf16.msra.mxu0 %v240_v11 }
  0x84   :  { %v68_v12 = vpop.xlane.xlu0 %67 }
  0x85   :  { %v71_v13 = vmax.f32 %v68_v12, 1e-24 }
  0x87   :  { %258 = vrsqrt.f32 %v71_v13  ;;  %vm79_vm1 = vweird.f32 %v71_v13 }
  0x8c   :  { %v70_v14 = vpop.xlane.xlu0 %69 }
  0x8d   :  { %v259_v15 = vpop.eup %258  ;;  %v72_v16 = vmax.f32 %v70_v14, 1e-24 }
  0x8e   :  { %v74_v17 = vmul.f32 %v259_v15, %v71_v13  ;;  %vm80_vm0 = vweird.f32 %v259_v15 }
  0x8f   :  { %260 = vrsqrt.f32 %v72_v16  ;;  %vm81_vm2 = vmor %vm79_vm1, %vm80_vm0  ;;  %vm89_vm4 = vweird.f32 %v72_v16 }
  0x90   :  { %v75_v18 = vmul.f32 %v259_v15, %v74_v17 }
  0x92   :  { %v76_v19 = vmul.f32 0.5, %v75_v18 }
  0x94   :  { %v77_v20 = vsub.f32 1.5, %v76_v19 }
  0x95   :  { %v261_v21 = vpop.eup %260 }
  0x96   :  { %v84_v22 = vmul.f32 %v261_v21, %v72_v16  ;;  %v78_v23 = vmul.f32 %v259_v15, %v77_v20  ;;  %vm90_vm3 = vweird.f32 %v261_v21 }
  0x97   :  { %vm91_vm5 = vmor %vm89_vm4, %vm90_vm3 }
  0x98   :  { %v85_v24 = vmul.f32 %v261_v21, %v84_v22  ;;  %v82_v27 = vsel %vm81_vm2, %v259_v15, %v78_v23 }
  0x99   :  { %v93_v29 = vmul.f32 %v82_v27, %v63_v0 }
  0x9a   :  { %v86_v25 = vmul.f32 0.5, %v85_v24 }
  0x9b   :  { %v99_v33 = vmul.f32 %v256_v30, %v93_v29 }
  0x9c   :  { %v87_v26 = vsub.f32 1.5, %v86_v25 }
  0x9e   :  { %v88_v28 = vmul.f32 %v261_v21, %v87_v26 }
  0xa0   :  { %v92_v31 = vsel %vm91_vm5, %v261_v21, %v88_v28 }
  0xa1   :  { %v94_v32 = vmul.f32 %v92_v31, %v64_v2 }
  0xa3   :  { %v100_v34 = vmul.f32 %v256_v30, %v94_v32 }
  0xa5   :  { %v101_v35 = vpack.c.bf16 %v100_v34, %v99_v33 }
  0xa7   :  { %178 = vmatmul.bf16.vlgmr.msra.gmra.mxu0 %v101_v35 }
 0x124   :  { %v179_v37 = vpop.f32.mrf.mxu0 }
 0x125   :  { %v180_v38 = vadd.f32 %v257_v36, %v179_v37 }
 0x127   :  { %v184_v39 = vadd.f32 %v180_v38, %v63_v0 }
 0x129   :  { %186 = vst [vmem:[#allocation8] sm:$0xff] %v184_v39 }
 0x12c   :  { %v181_v40 = vpop.f32.mrf.mxu0 }
 0x12d   :  { %v182_v41 = vadd.f32 %v257_v36, %v181_v40 }
 0x12f   :  { %v185_v42 = vadd.f32 %v182_v41, %v64_v2 }
 0x131   :  { %187 = vst [vmem:[#allocation8 + $0x8] sm:$0xff] %v185_v42 }
 0x132   :  { %200 = dma.vmem_to_hbm [thread:$0]  %s193_s8, 256, %s195_s11, [#allocation4], %s366_s25, %s366_s25, %s367_s26  }
 0x133   :  { %362 = dma.done.wait [#allocation4], 256  }
 0x134   :  { %363 = vsyncadd [#allocation4], 4294967040 }
 0x135   :  { %205 = vsyncpa [#allocation3], 1 }
 0x136   :  { %206 = vsyncpa [#allocation6], 1 }
 0x137   :  { %207 = vsyncpa [#allocation4], 1 }

// kernel: tpu_custom_call.1
= control target key start
LH: loop header
LB: loop body
LE: loop exit
PB: predicated region body
PF: predicated region fallthrough
CT: control target
= control target key end

     0   :  { %9 = vsyncpa [#allocation3], 0  ;;  %s418_s0 = inlined_call_operand.hbm [shape: f32[16,128], index: 0, kind: input, shape index: {}]   ;;  %s419_s1 = inlined_call_operand.hbm [shape: f32[1,128], index: 1, kind: input, shape index: {}]   ;;  %s420_s2 = inlined_call_operand.hbm [shape: bf16[128,128], index: 2, kind: input, shape index: {}]   ;;  %s421_s3 = inlined_call_operand.vmem [shape: f32[1,128], index: 3, kind: input, shape index: {}]   ;;  %s422_s4 = inlined_call_operand.hbm [shape: f32[16,128], index: 4, kind: output, shape index: {}]  }
   0x1   :  { %10 = vsyncpa [#allocation6], 0  ;;  %s30_s17 = sshll.u32 %s419_s1, 4  ;;  %s31_s17 = int_to_ptr.hbm [resolvable:$true] %s30_s17 }
   0x2   :  { %11 = vsyncpa [#allocation4], 0  ;;  %s364_s18 = smov [#allocation5]   ;;  %s16_s22 = sshll.u32 %s418_s0, 4  ;;  %s17_s22 = int_to_ptr.hbm [resolvable:$true] %s16_s22 }
   0x3   :  { %s32_s19 = sshll.u32 %s364_s18, 4  ;;  %s365_s23 = smov [#allocation2]   ;;  %s33_s19 = int_to_ptr.vmem [resolvable:$true] %s32_s19 }
   0x4   :  { %35 = dma.hbm_to_vmem [thread:$0]  %s31_s17, 16, %s33_s19, [#allocation6]  }
   0x5   :  { %s18_s24 = sshll.u32 %s365_s23, 4  ;;  %s366_s25 = smov 128   ;;  %s19_s24 = int_to_ptr.vmem [resolvable:$true] %s18_s24 }
   0x6   :  { %s367_s26 = smov 8   ;;  %s40_s28 = sshll.u32 %s420_s2, 4  ;;  %s41_s28 = int_to_ptr.hbm [resolvable:$true] %s40_s28 }
   0x7   :  { %24 = dma.hbm_to_vmem [thread:$0]  %s17_s22, 256, %s19_s24, [#allocation3], %s366_s25, %s366_s25, %s367_s26  }
   0x8   :  { %s368_s29 = smov [#allocation7]   ;;  %s369_s0 = smov 64  }
   0x9   :  { %s42_s30 = sshll.u32 %s368_s29, 4  ;;  %s370_s5 = smov 4   ;;  %s43_s30 = int_to_ptr.vmem [resolvable:$true] %s42_s30 }
   0xa   :  { %48 = dma.hbm_to_vmem [thread:$0]  %s41_s28, 1024, %s43_s30, [#allocation6], %s369_s0, %s369_s0, %s370_s5  }
   0xb   :  { %358 = dma.done.wait [#allocation3], 256  }
   0xc   :  { %359 = vsyncadd [#allocation3], 4294967040 }
   0xd   :  { %360 = dma.done.wait [#allocation6], 1040  }
   0xe   :  { %361 = vsyncadd [#allocation6], 4294966256  ;;  %v63_v0 = vld [vmem:[#allocation2] sm:$0xff]  ;;  %v64_v2 = vld [vmem:[#allocation2 + $0x8] sm:$0xff]  ;;  %s371_s7 = smov [#allocation8]   ;;  %s194_s11 = sshll.u32 %s422_s4, 4  ;;  %s195_s11 = int_to_ptr.hbm [resolvable:$true] %s194_s11 }
   0xf   :  { %v65_v1 = vmul.f32 %v63_v0, %v63_v0  ;;  %v66_v3 = vmul.f32 %v64_v2, %v64_v2  ;;  %v247_v4 = vld [vmem:[#allocation7 + $0x38] sm:$0xff]  ;;  %v246_v5 = vld [vmem:[#allocation7 + $0x30] sm:$0xff]  ;;  %v245_v6 = vld [vmem:[#allocation7 + $0x28] sm:$0xff]  ;;  %s192_s8 = sshll.u32 %s371_s7, 4  ;;  %s193_s8 = int_to_ptr.vmem [resolvable:$true] %s192_s8 }
  0x10   :  { %170 = vmatpush.bf16.msra.mxu0 %v247_v4  ;;  %v244_v7 = vld [vmem:[#allocation7 + $0x20] sm:$0xff]  ;;  %v243_v8 = vld [vmem:[#allocation7 + $0x18] sm:$0xff]  ;;  %v242_v9 = vld [vmem:[#allocation7 + $0x10] sm:$0xff] }
  0x11   :  { %67 = vadd.xlane.f32.xlu0 %v65_v1  ;;  %v241_v10 = vld [vmem:[#allocation7 + $0x8] sm:$0xff]  ;;  %v240_v11 = vld [vmem:[#allocation7] sm:$0xff]  ;;  %v256_v30 = vld [vmem:[#allocation5] ss:$0 sm:$0xff] }
  0x12   :  { %v257_v36 = vld [vmem:[%s421_s3] ss:$0 sm:$0xff] }
  0x14   :  { %171 = vmatpush.bf16.msra.mxu0 %v246_v5 }
  0x18   :  { %172 = vmatpush.bf16.msra.mxu0 %v245_v6 }
  0x19   :  { %69 = vadd.xlane.f32.xlu0 %v66_v3 }
  0x1c   :  { %173 = vmatpush.bf16.msra.mxu0 %v244_v7 }
  0x20   :  { %174 = vmatpush.bf16.msra.mxu0 %v243_v8 }
  0x24   :  { %175 = vmatpush.bf16.msra.mxu0 %v242_v9 }
  0x28   :  { %176 = vmatpush.bf16.msra.mxu0 %v241_v10 }
  0x2c   :  { %177 = vmatpush.bf16.msra.mxu0 %v240_v11 }
  0x84   :  { %v68_v12 = vpop.xlane.xlu0 %67 }
  0x85   :  { %v71_v13 = vmax.f32 %v68_v12, 1e-24 }
  0x87   :  { %258 = vrsqrt.f32 %v71_v13  ;;  %vm79_vm1 = vweird.f32 %v71_v13 }
  0x8c   :  { %v70_v14 = vpop.xlane.xlu0 %69 }
  0x8d   :  { %v259_v15 = vpop.eup %258  ;;  %v72_v16 = vmax.f32 %v70_v14, 1e-24 }
  0x8e   :  { %v74_v17 = vmul.f32 %v259_v15, %v71_v13  ;;  %vm80_vm0 = vweird.f32 %v259_v15 }
  0x8f   :  { %260 = vrsqrt.f32 %v72_v16  ;;  %vm81_vm2 = vmor %vm79_vm1, %vm80_vm0  ;;  %vm89_vm4 = vweird.f32 %v72_v16 }
  0x90   :  { %v75_v18 = vmul.f32 %v259_v15, %v74_v17 }
  0x92   :  { %v76_v19 = vmul.f32 0.5, %v75_v18 }
  0x94   :  { %v77_v20 = vsub.f32 1.5, %v76_v19 }
  0x95   :  { %v261_v21 = vpop.eup %260 }
  0x96   :  { %v84_v22 = vmul.f32 %v261_v21, %v72_v16  ;;  %v78_v23 = vmul.f32 %v259_v15, %v77_v20  ;;  %vm90_vm3 = vweird.f32 %v261_v21 }
  0x97   :  { %vm91_vm5 = vmor %vm89_vm4, %vm90_vm3 }
  0x98   :  { %v85_v24 = vmul.f32 %v261_v21, %v84_v22  ;;  %v82_v27 = vsel %vm81_vm2, %v259_v15, %v78_v23 }
  0x99   :  { %v93_v29 = vmul.f32 %v82_v27, %v63_v0 }
  0x9a   :  { %v86_v25 = vmul.f32 0.5, %v85_v24 }
  0x9b   :  { %v99_v33 = vmul.f32 %v256_v30, %v93_v29 }
  0x9c   :  { %v87_v26 = vsub.f32 1.5, %v86_v25 }
  0x9e   :  { %v88_v28 = vmul.f32 %v261_v21, %v87_v26 }
  0xa0   :  { %v92_v31 = vsel %vm91_vm5, %v261_v21, %v88_v28 }
  0xa1   :  { %v94_v32 = vmul.f32 %v92_v31, %v64_v2 }
  0xa3   :  { %v100_v34 = vmul.f32 %v256_v30, %v94_v32 }
  0xa5   :  { %v101_v35 = vpack.c.bf16 %v100_v34, %v99_v33 }
  0xa7   :  { %178 = vmatmul.bf16.vlgmr.msra.gmra.mxu0 %v101_v35 }
 0x124   :  { %v179_v37 = vpop.f32.mrf.mxu0 }
 0x125   :  { %v180_v38 = vadd.f32 %v257_v36, %v179_v37 }
 0x127   :  { %v184_v39 = vadd.f32 %v180_v38, %v63_v0 }
 0x129   :  { %186 = vst [vmem:[#allocation8] sm:$0xff] %v184_v39 }
 0x12c   :  { %v181_v40 = vpop.f32.mrf.mxu0 }
 0x12d   :  { %v182_v41 = vadd.f32 %v257_v36, %v181_v40 }
 0x12f   :  { %v185_v42 = vadd.f32 %v182_v41, %v64_v2 }
 0x131   :  { %187 = vst [vmem:[#allocation8 + $0x8] sm:$0xff] %v185_v42 }
 0x132   :  { %200 = dma.vmem_to_hbm [thread:$0]  %s193_s8, 256, %s195_s11, [#allocation4], %s366_s25, %s366_s25, %s367_s26  }
 0x133   :  { %362 = dma.done.wait [#allocation4], 256  }
 0x134   :  { %363 = vsyncadd [#allocation4], 4294967040 }
 0x135   :  { %205 = vsyncpa [#allocation3], 1 }
 0x136   :  { %206 = vsyncpa [#allocation6], 1 }
 0x137   :  { %207 = vsyncpa [#allocation4], 1 }

</bundles_post_ra>
